<compile_context>
chip_gen: v7x
topology: tpu7x:2x2x1
jax: 0.10.0
libtpu: 0.0.40
codegen_flags: <defaults>
</compile_context>

<pallas_src>
import functools

import jax
import jax.numpy as jnp
import numpy as np
from jax import lax
from jax.experimental import pallas as pl
from jax.experimental.pallas import tpu as pltpu

LANE = 128
_MAX_T_BLK = 8          # max fused time steps per grid step
_MAX_UNROLL = 4         # cap on the in-kernel time unroll (avoid vreg-spill pressure)


def _lif_zo_kernel(x_ref, z_ref, spk_ref, grad_ref, u_ref, *,
                   u_th, beta, delta, t_blk, unroll):
    """Process one (t_blk, s_tile, LANE) block: sequential LIF update over the fused
    time steps; membrane potential is carried across time blocks in VMEM scratch.

    NOTE: correctness of the recurrence requires the time axis to be the innermost
    grid axis (last) and marked "arbitrary"; any reordering or marking it "parallel"
    silently breaks the carry/reset below."""
    tb = pl.program_id(1)

    @pl.when(tb == 0)
    def _():
        u_ref[...] = jnp.zeros_like(u_ref)

    inv_2delta = 1.0 / (2.0 * delta)

    def step(t, u):
        x = x_ref[t].astype(jnp.float32)
        az = jnp.abs(z_ref[t].astype(jnp.float32))
        u = beta * u + x                                     # membrane update
        over = u > u_th                                      # spike condition (computed once)
        grad = jnp.where(jnp.abs(u - u_th) < delta * az,     # LocalZO surrogate
                         az * inv_2delta, 0.0)
        spk_ref[t] = jnp.where(over, 1.0, 0.0).astype(spk_ref.dtype)
        grad_ref[t] = grad.astype(grad_ref.dtype)
        return jnp.where(over, u - u_th, u)                  # soft reset

    u_ref[...] = lax.fori_loop(0, t_blk, step, u_ref[...], unroll=unroll)


def _hw_params():
    """Generation-aware block-size / VMEM-limit / megacore-split policy."""
    vmem_cap = 128 * 1024 * 1024            # v5e / v6e physical VMEM
    try:
        info = pltpu.get_tpu_info()
        vmem_cap = int(getattr(info, "vmem_capacity_bytes", vmem_cap))
    except Exception:
        pass
    multi_tc = vmem_cap <= 96 * 1024 * 1024  # v7x-class: 64 MiB per TC, 2 TCs/chip
    if multi_tc:
        target_block_bytes = 3 * 1024 * 1024
        vmem_limit_bytes = min(48 * 1024 * 1024, (vmem_cap * 3) // 4)
    else:
        target_block_bytes = 4 * 1024 * 1024
        vmem_limit_bytes = 64 * 1024 * 1024
    return target_block_bytes, vmem_limit_bytes, multi_tc


def _sublane_step(itemsize):
    """Native sublane packing granularity for the second-to-last block dim."""
    if itemsize >= 4:
        return 8
    if itemsize == 2:
        return 16
    return 32


def _pick_s_tile(S, budget_rows, sub_step, itemsize, multi_tc):
    """Feature tile (second-to-last block dim), dtype- and generation-aware.

    Single-TC parts: largest divisor of S that fits the row budget (no forced split).
    v7x-class parts: prefer an even tile count so both TCs get a balanced shard,
    provided each per-t contiguous run stays >= ~64 KiB."""
    divs = [d for d in range(sub_step, S + 1, sub_step) if S % d == 0]
    if not divs:
        return S                      # small / ragged S: full axis block is always legal
    if multi_tc:
        min_rows = max(sub_step, (64 * 1024) // (LANE * itemsize))
        even = [d for d in divs
                if (S // d) % 2 == 0 and min_rows <= d <= budget_rows]
        if even:
            return max(even)
    fit = [d for d in divs if d <= budget_rows]
    return max(fit) if fit else min(divs)


def _pick_t_blk(T, s_tile, budget_rows):
    """Largest divisor of T (capped) such that the block stays in the byte budget."""
    cap = max(1, min(T, _MAX_T_BLK, budget_rows // max(s_tile, 1)))
    best = 1
    for d in range(1, cap + 1):
        if T % d == 0:
            best = d
    return best


def leaky_zo_plain_once_forward(inputs, random_tangents, *, batch_size, u_th, beta,
                                delta=0.05):
    """Returns (spikes, zo_surrogate_grad); the torch forward returns `spikes` and
    stashes the surrogate grad for backward."""
    orig_shape = inputs.shape
    x_dtype = inputs.dtype
    z_dtype = random_tangents.dtype
    TB = orig_shape[0]
    assert TB % batch_size == 0, "leading dim must be T * batch_size"
    T = TB // batch_size
    F = batch_size
    for d in orig_shape[1:]:
        F *= d

    spk_dtype = x_dtype                              # keep I/O dtype for the spike train
    grad_dtype = jnp.promote_types(x_dtype, z_dtype)  # matches torch promotion of |z| * mask

    # No wrapper-side dtype casts: x and z stream through in their native dtypes and are
    # promoted to f32 inside the kernel (free VPU slack), avoiding an extra HBM round trip.
    x2 = inputs.reshape(T, F)
    z2 = random_tangents.reshape(T, F)

    F_pad = ((F + LANE - 1) // LANE) * LANE
    padded = F_pad != F
    if padded:
        # TODO(synk): replace this pad/slice round trip (only hit when F % 128 != 0) with
        # ragged edge blocks + masked stores; conv feature maps are normally 128-aligned
        # so the fast path below skips it entirely.
        pad = F_pad - F
        x2 = jnp.pad(x2, ((0, 0), (0, pad)))
        z2 = jnp.pad(z2, ((0, 0), (0, pad)))
    S = F_pad // LANE

    itemsizes = [jnp.dtype(d).itemsize for d in (x_dtype, z_dtype, spk_dtype, grad_dtype)]
    max_item = max(itemsizes)
    target_block_bytes, vmem_limit_bytes, multi_tc = _hw_params()

    sub_step = _sublane_step(min(itemsizes))          # bf16 packs 2 rows/sublane, etc.
    budget_rows = max(sub_step, target_block_bytes // (LANE * max_item))
    s_tile = _pick_s_tile(S, budget_rows, sub_step, max_item, multi_tc)
    t_blk = _pick_t_blk(T, s_tile, budget_rows)
    unroll = max(d for d in range(1, _MAX_UNROLL + 1) if t_blk % d == 0)

    grid = (S // s_tile, T // t_blk)
    spec = pl.BlockSpec((t_blk, s_tile, LANE), lambda si, tb: (tb, si, 0))

    kernel = functools.partial(
        _lif_zo_kernel, u_th=float(u_th), beta=float(beta), delta=float(delta),
        t_blk=t_blk, unroll=unroll)

    # Memory-bound elementwise recurrence: 2 input + 2 output streams, ~8 VALU ops per
    # element, no transcendentals; bytes reflect the actual per-stream dtypes.
    cost = pl.CostEstimate(
        flops=8 * T * F_pad,
        transcendentals=0,
        bytes_accessed=T * F_pad * sum(itemsizes))

    spikes3, grad3 = pl.pallas_call(
        kernel,
        out_shape=(jax.ShapeDtypeStruct((T, S, LANE), spk_dtype),
                   jax.ShapeDtypeStruct((T, S, LANE), grad_dtype)),
        grid_spec=pltpu.PrefetchScalarGridSpec(
            num_scalar_prefetch=0,
            grid=grid,
            in_specs=[spec, spec],
            out_specs=(spec, spec),
            scratch_shapes=[pltpu.VMEM((s_tile, LANE), jnp.float32)]),
        compiler_params=pltpu.CompilerParams(
            dimension_semantics=("parallel", "arbitrary"),
            vmem_limit_bytes=vmem_limit_bytes),
        cost_estimate=cost,
    )(x2.reshape(T, S, LANE), z2.reshape(T, S, LANE))

    if padded:
        spikes = spikes3.reshape(T, F_pad)[:, :F].reshape(orig_shape)
        zo_grad = grad3.reshape(T, F_pad)[:, :F].reshape(orig_shape)
    else:
        spikes = spikes3.reshape(orig_shape)
        zo_grad = grad3.reshape(orig_shape)
    return spikes, zo_grad


def _reference_forward(inputs, z, batch_size, u_th, beta, delta):
    """Pure-JAX reference matching the PyTorch PlainLIFLocalZOOnce forward."""
    T = inputs.shape[0] // batch_size
    x = inputs.reshape(T, batch_size, *inputs.shape[1:]).astype(jnp.float32)
    zt = z.reshape(T, batch_size, *inputs.shape[1:]).astype(jnp.float32)
    u = jnp.zeros_like(x[0])
    spikes, grads = [], []
    for t in range(T):
        u = beta * u + x[t]
        s = (u > u_th).astype(jnp.float32)
        az = jnp.abs(zt[t])
        g = jnp.where(jnp.abs(u - u_th) < delta * az, az / (2.0 * delta), 0.0)
        spikes.append(s)
        grads.append(g)
        u = u - s * u_th
    return (jnp.concatenate(spikes, axis=0).reshape(inputs.shape),
            jnp.concatenate(grads, axis=0).reshape(inputs.shape))


if __name__ == "__main__":
    # Module hyperparameters (LeakyZOPlainOnce(u_th, beta, batch_size, delta=0.05)).
    u_th = 1.0
    beta = 0.5
    batch_size = 2
    delta = 0.05
    T = 4          # number of time steps
    C, H, W = 4, 8, 8

    key = jax.random.PRNGKey(0)
    kx, kz = jax.random.split(key)
    # inputs stacked time-major: (T * batch_size, C, H, W), NCHW
    x = 1.5 * jax.random.normal(kx, (T * batch_size, C, H, W), dtype=jnp.float32)
    # NormalOnceSampler: one N(0,1) tangent per input element (synthetic, deterministic).
    z = jax.random.normal(kz, (T * batch_size, C, H, W), dtype=jnp.float32)

    spikes, zo_grad = leaky_zo_plain_once_forward(
        x, z, batch_size=batch_size, u_th=u_th, beta=beta, delta=delta)
    spikes = jax.block_until_ready(spikes)
    zo_grad = jax.block_until_ready(zo_grad)

    ref_spikes, ref_grad = _reference_forward(x, z, batch_size, u_th, beta, delta)
    np.testing.assert_allclose(np.asarray(spikes), np.asarray(ref_spikes), atol=1e-6)
    np.testing.assert_allclose(np.asarray(zo_grad), np.asarray(ref_grad),
                               rtol=1e-5, atol=1e-6)

    print("KERNEL_OK")
</pallas_src>

<mosaic_0001>
module attributes {stable_mosaic.version = 11 : i64} {
  func.func @_lif_zo_kernel(%arg0: i32, %arg1: i32, %arg2: memref<4x4x128xf32, #tpu.memory_space<vmem>>, %arg3: memref<4x4x128xf32, #tpu.memory_space<vmem>>, %arg4: memref<4x4x128xf32, #tpu.memory_space<vmem>>, %arg5: memref<4x4x128xf32, #tpu.memory_space<vmem>>, %arg6: memref<4x128xf32, #tpu.memory_space<vmem>>) attributes {dimension_semantics = [#tpu.dimension_semantics<parallel>, #tpu.dimension_semantics<arbitrary>], iteration_bounds = array<i64: 1, 1>, scalar_prefetch = 0 : i64, scratch_operands = 1 : i64, tpu.core_type = #tpu.core_type<tc>, window_params = [{transform_indices = @transform_0, window_bounds = array<i64: 4, 4, 128>}, {transform_indices = @transform_1, window_bounds = array<i64: 4, 4, 128>}, {transform_indices = @transform_2, window_bounds = array<i64: 4, 4, 128>}, {transform_indices = @transform_3, window_bounds = array<i64: 4, 4, 128>}]} {
    %c0_i32 = arith.constant 0 : i32
    %0 = arith.cmpi eq, %arg1, %c0_i32 : i32
    %1 = arith.extui %0 : i1 to i32
    %c0_i32_0 = arith.constant 0 : i32
    %2 = arith.cmpi ne, %1, %c0_i32_0 : i32
    scf.if %2 {
      %cst_72 = arith.constant 0.000000e+00 : f32
      %149 = vector.broadcast %cst_72 : f32 to vector<4x128xf32>
      %c0_73 = arith.constant 0 : index
      %c0_74 = arith.constant 0 : index
      %150 = vector.load %arg6[%c0_73, %c0_74] : memref<4x128xf32, #tpu.memory_space<vmem>>, vector<4x128xf32>
      tpu.vector_store %arg6[%c0_73, %c0_74], %149 {strides = array<i32>} : memref<4x128xf32, #tpu.memory_space<vmem>>, vector<4x128xf32>,
    } else {
    }
    %c0 = arith.constant 0 : index
    %c0_1 = arith.constant 0 : index
    %3 = vector.load %arg6[%c0, %c0_1] : memref<4x128xf32, #tpu.memory_space<vmem>>, vector<4x128xf32>
    %c0_i32_2 = arith.constant 0 : i32
    %4 = arith.index_cast %c0_i32_2 : i32 to index
    %c0_3 = arith.constant 0 : index
    %c0_4 = arith.constant 0 : index
    %5 = vector.load %arg2[%4, %c0_3, %c0_4] : memref<4x4x128xf32, #tpu.memory_space<vmem>>, vector<1x4x128xf32>
    %6 = vector.shape_cast %5 : vector<1x4x128xf32> to vector<4x128xf32>
    %7 = arith.index_cast %c0_i32_2 : i32 to index
    %c0_5 = arith.constant 0 : index
    %c0_6 = arith.constant 0 : index
    %8 = vector.load %arg3[%7, %c0_5, %c0_6] : memref<4x4x128xf32, #tpu.memory_space<vmem>>, vector<1x4x128xf32>
    %9 = vector.shape_cast %8 : vector<1x4x128xf32> to vector<4x128xf32>
    %10 = math.absf %9 : vector<4x128xf32>
    %cst = arith.constant 5.000000e-01 : f32
    %11 = vector.broadcast %cst : f32 to vector<4x128xf32>
    %12 = arith.mulf %11, %3 : vector<4x128xf32>
    %13 = arith.addf %12, %6 : vector<4x128xf32>
    %cst_7 = arith.constant 1.000000e+00 : f32
    %14 = vector.broadcast %cst_7 : f32 to vector<4x128xf32>
    %15 = arith.cmpf ogt, %13, %14 : vector<4x128xf32>
    %cst_8 = arith.constant 1.000000e+00 : f32
    %16 = vector.broadcast %cst_8 : f32 to vector<4x128xf32>
    %17 = arith.subf %13, %16 : vector<4x128xf32>
    %18 = math.absf %17 : vector<4x128xf32>
    %cst_9 = arith.constant 5.000000e-02 : f32
    %19 = vector.broadcast %cst_9 : f32 to vector<4x128xf32>
    %20 = arith.mulf %19, %10 : vector<4x128xf32>
    %21 = arith.cmpf olt, %18, %20 : vector<4x128xf32>
    %cst_10 = arith.constant 1.000000e+01 : f32
    %22 = vector.broadcast %cst_10 : f32 to vector<4x128xf32>
    %23 = arith.mulf %10, %22 : vector<4x128xf32>
    %cst_11 = arith.constant 0.000000e+00 : f32
    %24 = vector.broadcast %cst_11 : f32 to vector<4x128xf32>
    %25 = arith.select %21, %23, %24 : vector<4x128xi1>, vector<4x128xf32>
    %cst_12 = arith.constant 1.000000e+00 : f32
    %cst_13 = arith.constant 0.000000e+00 : f32
    %26 = vector.broadcast %cst_12 : f32 to vector<4x128xf32>
    %27 = vector.broadcast %cst_13 : f32 to vector<4x128xf32>
    %28 = arith.select %15, %26, %27 : vector<4x128xi1>, vector<4x128xf32>
    %29 = arith.index_cast %c0_i32_2 : i32 to index
    %c0_14 = arith.constant 0 : index
    %c0_15 = arith.constant 0 : index
    %30 = vector.load %arg4[%29, %c0_14, %c0_15] : memref<4x4x128xf32, #tpu.memory_space<vmem>>, vector<1x4x128xf32>
    %31 = vector.shape_cast %30 : vector<1x4x128xf32> to vector<4x128xf32>
    %32 = vector.shape_cast %28 : vector<4x128xf32> to vector<1x4x128xf32>
    tpu.vector_store %arg4[%29, %c0_14, %c0_15], %32 {strides = array<i32>} : memref<4x4x128xf32, #tpu.memory_space<vmem>>, vector<1x4x128xf32>,
    %33 = arith.index_cast %c0_i32_2 : i32 to index
    %c0_16 = arith.constant 0 : index
    %c0_17 = arith.constant 0 : index
    %34 = vector.load %arg5[%33, %c0_16, %c0_17] : memref<4x4x128xf32, #tpu.memory_space<vmem>>, vector<1x4x128xf32>
    %35 = vector.shape_cast %34 : vector<1x4x128xf32> to vector<4x128xf32>
    %36 = vector.shape_cast %25 : vector<4x128xf32> to vector<1x4x128xf32>
    tpu.vector_store %arg5[%33, %c0_16, %c0_17], %36 {strides = array<i32>} : memref<4x4x128xf32, #tpu.memory_space<vmem>>, vector<1x4x128xf32>,
    %cst_18 = arith.constant 1.000000e+00 : f32
    %37 = vector.broadcast %cst_18 : f32 to vector<4x128xf32>
    %38 = arith.subf %13, %37 : vector<4x128xf32>
    %39 = arith.select %15, %38, %13 : vector<4x128xi1>, vector<4x128xf32>
    %c1_i32 = arith.constant 1 : i32
    %40 = arith.index_cast %c1_i32 : i32 to index
    %c0_19 = arith.constant 0 : index
    %c0_20 = arith.constant 0 : index
    %41 = vector.load %arg2[%40, %c0_19, %c0_20] : memref<4x4x128xf32, #tpu.memory_space<vmem>>, vector<1x4x128xf32>
    %42 = vector.shape_cast %41 : vector<1x4x128xf32> to vector<4x128xf32>
    %43 = arith.index_cast %c1_i32 : i32 to index
    %c0_21 = arith.constant 0 : index
    %c0_22 = arith.constant 0 : index
    %44 = vector.load %arg3[%43, %c0_21, %c0_22] : memref<4x4x128xf32, #tpu.memory_space<vmem>>, vector<1x4x128xf32>
    %45 = vector.shape_cast %44 : vector<1x4x128xf32> to vector<4x128xf32>
    %46 = math.absf %45 : vector<4x128xf32>
    %cst_23 = arith.constant 5.000000e-01 : f32
    %47 = vector.broadcast %cst_23 : f32 to vector<4x128xf32>
    %48 = arith.mulf %47, %39 : vector<4x128xf32>
    %49 = arith.addf %48, %42 : vector<4x128xf32>
    %cst_24 = arith.constant 1.000000e+00 : f32
    %50 = vector.broadcast %cst_24 : f32 to vector<4x128xf32>
    %51 = arith.cmpf ogt, %49, %50 : vector<4x128xf32>
    %cst_25 = arith.constant 1.000000e+00 : f32
    %52 = vector.broadcast %cst_25 : f32 to vector<4x128xf32>
    %53 = arith.subf %49, %52 : vector<4x128xf32>
    %54 = math.absf %53 : vector<4x128xf32>
    %cst_26 = arith.constant 5.000000e-02 : f32
    %55 = vector.broadcast %cst_26 : f32 to vector<4x128xf32>
    %56 = arith.mulf %55, %46 : vector<4x128xf32>
    %57 = arith.cmpf olt, %54, %56 : vector<4x128xf32>
    %cst_27 = arith.constant 1.000000e+01 : f32
    %58 = vector.broadcast %cst_27 : f32 to vector<4x128xf32>
    %59 = arith.mulf %46, %58 : vector<4x128xf32>
    %cst_28 = arith.constant 0.000000e+00 : f32
    %60 = vector.broadcast %cst_28 : f32 to vector<4x128xf32>
    %61 = arith.select %57, %59, %60 : vector<4x128xi1>, vector<4x128xf32>
    %cst_29 = arith.constant 1.000000e+00 : f32
    %cst_30 = arith.constant 0.000000e+00 : f32
    %62 = vector.broadcast %cst_29 : f32 to vector<4x128xf32>
    %63 = vector.broadcast %cst_30 : f32 to vector<4x128xf32>
    %64 = arith.select %51, %62, %63 : vector<4x128xi1>, vector<4x128xf32>
    %65 = arith.index_cast %c1_i32 : i32 to index
    %c0_31 = arith.constant 0 : index
    %c0_32 = arith.constant 0 : index
    %66 = vector.load %arg4[%65, %c0_31, %c0_32] : memref<4x4x128xf32, #tpu.memory_space<vmem>>, vector<1x4x128xf32>
    %67 = vector.shape_cast %66 : vector<1x4x128xf32> to vector<4x128xf32>
    %68 = vector.shape_cast %64 : vector<4x128xf32> to vector<1x4x128xf32>
    tpu.vector_store %arg4[%65, %c0_31, %c0_32], %68 {strides = array<i32>} : memref<4x4x128xf32, #tpu.memory_space<vmem>>, vector<1x4x128xf32>,
    %69 = arith.index_cast %c1_i32 : i32 to index
    %c0_33 = arith.constant 0 : index
    %c0_34 = arith.constant 0 : index
    %70 = vector.load %arg5[%69, %c0_33, %c0_34] : memref<4x4x128xf32, #tpu.memory_space<vmem>>, vector<1x4x128xf32>
    %71 = vector.shape_cast %70 : vector<1x4x128xf32> to vector<4x128xf32>
    %72 = vector.shape_cast %61 : vector<4x128xf32> to vector<1x4x128xf32>
    tpu.vector_store %arg5[%69, %c0_33, %c0_34], %72 {strides = array<i32>} : memref<4x4x128xf32, #tpu.memory_space<vmem>>, vector<1x4x128xf32>,
    %cst_35 = arith.constant 1.000000e+00 : f32
    %73 = vector.broadcast %cst_35 : f32 to vector<4x128xf32>
    %74 = arith.subf %49, %73 : vector<4x128xf32>
    %75 = arith.select %51, %74, %49 : vector<4x128xi1>, vector<4x128xf32>
    %c2_i32 = arith.constant 2 : i32
    %76 = arith.index_cast %c2_i32 : i32 to index
    %c0_36 = arith.constant 0 : index
    %c0_37 = arith.constant 0 : index
    %77 = vector.load %arg2[%76, %c0_36, %c0_37] : memref<4x4x128xf32, #tpu.memory_space<vmem>>, vector<1x4x128xf32>
    %78 = vector.shape_cast %77 : vector<1x4x128xf32> to vector<4x128xf32>
    %79 = arith.index_cast %c2_i32 : i32 to index
    %c0_38 = arith.constant 0 : index
    %c0_39 = arith.constant 0 : index
    %80 = vector.load %arg3[%79, %c0_38, %c0_39] : memref<4x4x128xf32, #tpu.memory_space<vmem>>, vector<1x4x128xf32>
    %81 = vector.shape_cast %80 : vector<1x4x128xf32> to vector<4x128xf32>
    %82 = math.absf %81 : vector<4x128xf32>
    %cst_40 = arith.constant 5.000000e-01 : f32
    %83 = vector.broadcast %cst_40 : f32 to vector<4x128xf32>
    %84 = arith.mulf %83, %75 : vector<4x128xf32>
    %85 = arith.addf %84, %78 : vector<4x128xf32>
    %cst_41 = arith.constant 1.000000e+00 : f32
    %86 = vector.broadcast %cst_41 : f32 to vector<4x128xf32>
    %87 = arith.cmpf ogt, %85, %86 : vector<4x128xf32>
    %cst_42 = arith.constant 1.000000e+00 : f32
    %88 = vector.broadcast %cst_42 : f32 to vector<4x128xf32>
    %89 = arith.subf %85, %88 : vector<4x128xf32>
    %90 = math.absf %89 : vector<4x128xf32>
    %cst_43 = arith.constant 5.000000e-02 : f32
    %91 = vector.broadcast %cst_43 : f32 to vector<4x128xf32>
    %92 = arith.mulf %91, %82 : vector<4x128xf32>
    %93 = arith.cmpf olt, %90, %92 : vector<4x128xf32>
    %cst_44 = arith.constant 1.000000e+01 : f32
    %94 = vector.broadcast %cst_44 : f32 to vector<4x128xf32>
    %95 = arith.mulf %82, %94 : vector<4x128xf32>
    %cst_45 = arith.constant 0.000000e+00 : f32
    %96 = vector.broadcast %cst_45 : f32 to vector<4x128xf32>
    %97 = arith.select %93, %95, %96 : vector<4x128xi1>, vector<4x128xf32>
    %cst_46 = arith.constant 1.000000e+00 : f32
    %cst_47 = arith.constant 0.000000e+00 : f32
    %98 = vector.broadcast %cst_46 : f32 to vector<4x128xf32>
    %99 = vector.broadcast %cst_47 : f32 to vector<4x128xf32>
    %100 = arith.select %87, %98, %99 : vector<4x128xi1>, vector<4x128xf32>
    %101 = arith.index_cast %c2_i32 : i32 to index
    %c0_48 = arith.constant 0 : index
    %c0_49 = arith.constant 0 : index
    %102 = vector.load %arg4[%101, %c0_48, %c0_49] : memref<4x4x128xf32, #tpu.memory_space<vmem>>, vector<1x4x128xf32>
    %103 = vector.shape_cast %102 : vector<1x4x128xf32> to vector<4x128xf32>
    %104 = vector.shape_cast %100 : vector<4x128xf32> to vector<1x4x128xf32>
    tpu.vector_store %arg4[%101, %c0_48, %c0_49], %104 {strides = array<i32>} : memref<4x4x128xf32, #tpu.memory_space<vmem>>, vector<1x4x128xf32>,
    %105 = arith.index_cast %c2_i32 : i32 to index
    %c0_50 = arith.constant 0 : index
    %c0_51 = arith.constant 0 : index
    %106 = vector.load %arg5[%105, %c0_50, %c0_51] : memref<4x4x128xf32, #tpu.memory_space<vmem>>, vector<1x4x128xf32>
    %107 = vector.shape_cast %106 : vector<1x4x128xf32> to vector<4x128xf32>
    %108 = vector.shape_cast %97 : vector<4x128xf32> to vector<1x4x128xf32>
    tpu.vector_store %arg5[%105, %c0_50, %c0_51], %108 {strides = array<i32>} : memref<4x4x128xf32, #tpu.memory_space<vmem>>, vector<1x4x128xf32>,
    %cst_52 = arith.constant 1.000000e+00 : f32
    %109 = vector.broadcast %cst_52 : f32 to vector<4x128xf32>
    %110 = arith.subf %85, %109 : vector<4x128xf32>
    %111 = arith.select %87, %110, %85 : vector<4x128xi1>, vector<4x128xf32>
    %c3_i32 = arith.constant 3 : i32
    %112 = arith.index_cast %c3_i32 : i32 to index
    %c0_53 = arith.constant 0 : index
    %c0_54 = arith.constant 0 : index
    %113 = vector.load %arg2[%112, %c0_53, %c0_54] : memref<4x4x128xf32, #tpu.memory_space<vmem>>, vector<1x4x128xf32>
    %114 = vector.shape_cast %113 : vector<1x4x128xf32> to vector<4x128xf32>
    %115 = arith.index_cast %c3_i32 : i32 to index
    %c0_55 = arith.constant 0 : index
    %c0_56 = arith.constant 0 : index
    %116 = vector.load %arg3[%115, %c0_55, %c0_56] : memref<4x4x128xf32, #tpu.memory_space<vmem>>, vector<1x4x128xf32>
    %117 = vector.shape_cast %116 : vector<1x4x128xf32> to vector<4x128xf32>
    %118 = math.absf %117 : vector<4x128xf32>
    %cst_57 = arith.constant 5.000000e-01 : f32
    %119 = vector.broadcast %cst_57 : f32 to vector<4x128xf32>
    %120 = arith.mulf %119, %111 : vector<4x128xf32>
    %121 = arith.addf %120, %114 : vector<4x128xf32>
    %cst_58 = arith.constant 1.000000e+00 : f32
    %122 = vector.broadcast %cst_58 : f32 to vector<4x128xf32>
    %123 = arith.cmpf ogt, %121, %122 : vector<4x128xf32>
    %cst_59 = arith.constant 1.000000e+00 : f32
    %124 = vector.broadcast %cst_59 : f32 to vector<4x128xf32>
    %125 = arith.subf %121, %124 : vector<4x128xf32>
    %126 = math.absf %125 : vector<4x128xf32>
    %cst_60 = arith.constant 5.000000e-02 : f32
    %127 = vector.broadcast %cst_60 : f32 to vector<4x128xf32>
    %128 = arith.mulf %127, %118 : vector<4x128xf32>
    %129 = arith.cmpf olt, %126, %128 : vector<4x128xf32>
    %cst_61 = arith.constant 1.000000e+01 : f32
    %130 = vector.broadcast %cst_61 : f32 to vector<4x128xf32>
    %131 = arith.mulf %118, %130 : vector<4x128xf32>
    %cst_62 = arith.constant 0.000000e+00 : f32
    %132 = vector.broadcast %cst_62 : f32 to vector<4x128xf32>
    %133 = arith.select %129, %131, %132 : vector<4x128xi1>, vector<4x128xf32>
    %cst_63 = arith.constant 1.000000e+00 : f32
    %cst_64 = arith.constant 0.000000e+00 : f32
    %134 = vector.broadcast %cst_63 : f32 to vector<4x128xf32>
    %135 = vector.broadcast %cst_64 : f32 to vector<4x128xf32>
    %136 = arith.select %123, %134, %135 : vector<4x128xi1>, vector<4x128xf32>
    %137 = arith.index_cast %c3_i32 : i32 to index
    %c0_65 = arith.constant 0 : index
    %c0_66 = arith.constant 0 : index
    %138 = vector.load %arg4[%137, %c0_65, %c0_66] : memref<4x4x128xf32, #tpu.memory_space<vmem>>, vector<1x4x128xf32>
    %139 = vector.shape_cast %138 : vector<1x4x128xf32> to vector<4x128xf32>
    %140 = vector.shape_cast %136 : vector<4x128xf32> to vector<1x4x128xf32>
    tpu.vector_store %arg4[%137, %c0_65, %c0_66], %140 {strides = array<i32>} : memref<4x4x128xf32, #tpu.memory_space<vmem>>, vector<1x4x128xf32>,
    %141 = arith.index_cast %c3_i32 : i32 to index
    %c0_67 = arith.constant 0 : index
    %c0_68 = arith.constant 0 : index
    %142 = vector.load %arg5[%141, %c0_67, %c0_68] : memref<4x4x128xf32, #tpu.memory_space<vmem>>, vector<1x4x128xf32>
    %143 = vector.shape_cast %142 : vector<1x4x128xf32> to vector<4x128xf32>
    %144 = vector.shape_cast %133 : vector<4x128xf32> to vector<1x4x128xf32>
    tpu.vector_store %arg5[%141, %c0_67, %c0_68], %144 {strides = array<i32>} : memref<4x4x128xf32, #tpu.memory_space<vmem>>, vector<1x4x128xf32>,
    %cst_69 = arith.constant 1.000000e+00 : f32
    %145 = vector.broadcast %cst_69 : f32 to vector<4x128xf32>
    %146 = arith.subf %121, %145 : vector<4x128xf32>
    %147 = arith.select %123, %146, %121 : vector<4x128xi1>, vector<4x128xf32>
    %c4_i32 = arith.constant 4 : i32
    %c0_70 = arith.constant 0 : index
    %c0_71 = arith.constant 0 : index
    %148 = vector.load %arg6[%c0_70, %c0_71] : memref<4x128xf32, #tpu.memory_space<vmem>>, vector<4x128xf32>
    tpu.vector_store %arg6[%c0_70, %c0_71], %147 {strides = array<i32>} : memref<4x128xf32, #tpu.memory_space<vmem>>, vector<4x128xf32>,
    return
  }
  func.func @transform_0(%arg0: i32, %arg1: i32) -> (i32, i32, i32) {
    %c0_i32 = arith.constant 0 : i32
    %c0_i32_0 = arith.constant 0 : i32
    return %arg1, %arg0, %c0_i32 : i32, i32, i32
  }
  func.func @transform_1(%arg0: i32, %arg1: i32) -> (i32, i32, i32) {
    %c0_i32 = arith.constant 0 : i32
    %c0_i32_0 = arith.constant 0 : i32
    return %arg1, %arg0, %c0_i32 : i32, i32, i32
  }
  func.func @transform_2(%arg0: i32, %arg1: i32) -> (i32, i32, i32) {
    %c0_i32 = arith.constant 0 : i32
    %c0_i32_0 = arith.constant 0 : i32
    return %arg1, %arg0, %c0_i32 : i32, i32, i32
  }
  func.func @transform_3(%arg0: i32, %arg1: i32) -> (i32, i32, i32) {
    %c0_i32 = arith.constant 0 : i32
    %c0_i32_0 = arith.constant 0 : i32
    return %arg1, %arg0, %c0_i32 : i32, i32, i32
  }
}

</mosaic_0001>

<bundles_post_ra>
// kernel: tpu_custom_call.1
= control target key start
LH: loop header
LB: loop body
LE: loop exit
PB: predicated region body
PF: predicated region fallthrough
CT: control target
= control target key end

     0   :  { %9 = vsyncpa [#allocation4], 0  ;;  %s354_s0 = inlined_call_operand.hbm [shape: f32[4,4,128], index: 0, kind: input, shape index: {}]   ;;  %s355_s1 = inlined_call_operand.hbm [shape: f32[4,4,128], index: 1, kind: input, shape index: {}]   ;;  %s356_s2 = inlined_call_operand.hbm [shape: f32[4,4,128], index: 2, kind: output, shape index: {0}]   ;;  %s357_s3 = inlined_call_operand.hbm [shape: f32[4,4,128], index: 3, kind: output, shape index: {1}]  }
   0x1   :  { %10 = vsyncpa [#allocation7], 0 }
   0x2   :  { %11 = vsyncpa [#allocation5], 0 }
   0x3   :  { %12 = vsyncpa [#allocation10], 0  ;;  %s267_s12 = smov [#allocation3]   ;;  %s171_s16 = scalar_lea.hbm %s354_s0, 256 }
   0x4   :  { %s18_s13 = sshll.u32 %s267_s12, 4  ;;  %p172_p0 = scmp.ne.s32.totalorder %s354_s0, %s171_s16  ;;  %s19_s13 = int_to_ptr.vmem [resolvable:$true] %s18_s13 }
   0x5   :  { %p175_p1 = scmp.lt.u32.totalorder %s171_s16, %s354_s0 }
   0x7   :  { %p177_p2 = pnand %p175_p1, %p172_p0 }
   0x9   :  { %180 = shalt.err (!%p177_p2)
}
   0xa   :  { %s181_s21 = scalar_lea.vmem %s19_s13, 256  ;;  %p186_p4 = scmp.lt.s32.totalorder %s19_s13, %s19_s13 }
   0xb   :  { %p182_p3 = scmp.ne.s32.totalorder %s19_s13, %s181_s21  ;;  %p187_p5 = scmp.lt.s32.totalorder %s181_s21, %s181_s21 }
   0xd   :  { %p188_p6 = por %p187_p5, %p186_p4 }
   0xf   :  { %p189_p7 = pnand %p188_p6, %p182_p3 }
  0x11   :  { %192 = shalt.err (!%p189_p7)
}
  0x12   :  { %s268_s22 = smov 64   ;;  %s269_s23 = smov 4  }
  0x13   :  { %24 = dma.hbm_to_vmem [thread:$0]  %s354_s0, 256, %s19_s13, [#allocation4], %s268_s22, %s268_s22, %s269_s23  }
  0x14   :  { %s270_s26 = smov [#allocation6]   ;;  %s193_s30 = scalar_lea.hbm %s355_s1, 256 }
  0x15   :  { %s30_s27 = sshll.u32 %s270_s26, 4  ;;  %p194_p8 = scmp.ne.s32.totalorder %s355_s1, %s193_s30  ;;  %s31_s27 = int_to_ptr.vmem [resolvable:$true] %s30_s27 }
  0x16   :  { %p197_p9 = scmp.lt.u32.totalorder %s193_s30, %s355_s1 }
  0x18   :  { %p199_p10 = pnand %p197_p9, %p194_p8 }
  0x1a   :  { %202 = shalt.err (!%p199_p10)
}
  0x1b   :  { %s203_s8 = scalar_lea.vmem %s31_s27, 256  ;;  %p208_p12 = scmp.lt.s32.totalorder %s31_s27, %s31_s27 }
  0x1c   :  { %p204_p11 = scmp.ne.s32.totalorder %s31_s27, %s203_s8  ;;  %p209_p13 = scmp.lt.s32.totalorder %s203_s8, %s203_s8 }
  0x1e   :  { %p210_p0 = por %p209_p13, %p208_p12 }
  0x20   :  { %p211_p1 = pnand %p210_p0, %p204_p11 }
  0x22   :  { %214 = shalt.err (!%p211_p1)
}
  0x23   :  { %36 = dma.hbm_to_vmem [thread:$0]  %s355_s1, 256, %s31_s27, [#allocation7], %s268_s22, %s268_s22, %s269_s23  }
  0x24   :  { %259 = dma.done.wait [#allocation4], 256  }
  0x25   :  { %260 = vsyncadd [#allocation4], 4294967040 }
  0x26   :  { %261 = dma.done.wait [#allocation7], 256  }
  0x27   :  { %262 = vsyncadd [#allocation7], 4294967040  ;;  %v271_v0 = vmov 0.0   ;;  %v50_v1 = vld [vmem:[#allocation6] sm:$0xf]  ;;  %s272_s1 = smov [#allocation8]  }
  0x28   :  { %47 = vst [vmem:[#allocation2] sm:$0xf] %v271_v0  ;;  %v49_v3 = vld [vmem:[#allocation3] sm:$0xf]  ;;  %v51_v5 = vand.u32 2147483647, %v50_v1 }
  0x29   :  { %v68_v9 = vld [vmem:[#allocation6 + $0x4] sm:$0xf]  ;;  %v66_v14 = vld [vmem:[#allocation3 + $0x4] sm:$0xf]  ;;  %v88_v21 = vld [vmem:[#allocation6 + $0x8] sm:$0xf] }
  0x2a   :  { %v57_v8 = vmul.f32 0.05, %v51_v5  ;;  %v59_v11 = vmul.f32 10.0, %v51_v5  ;;  %v69_v16 = vand.u32 2147483647, %v68_v9  ;;  %s131_s10 = sshll.u32 %s272_s1, 4  ;;  %s132_s10 = int_to_ptr.vmem [resolvable:$true] %s131_s10 }
  0x2b   :  { %v86_v26 = vld [vmem:[#allocation3 + $0x8] sm:$0xf]  ;;  %v89_v28 = vand.u32 2147483647, %v88_v21  ;;  %v108_v33 = vld [vmem:[#allocation6 + $0xc] sm:$0xf]  ;;  %p220_p3 = scmp.lt.s32.totalorder %s132_s10, %s132_s10 }
  0x2c   :  { %v75_v20 = vmul.f32 0.05, %v69_v16  ;;  %v77_v23 = vmul.f32 10.0, %v69_v16  ;;  %v106_v38 = vld [vmem:[#allocation3 + $0xc] sm:$0xf]  ;;  %s273_s11 = smov [#allocation9]  }
  0x2d   :  { %v95_v32 = vmul.f32 0.05, %v89_v28  ;;  %v97_v35 = vmul.f32 10.0, %v89_v28  ;;  %v109_v40 = vand.u32 2147483647, %v108_v33  ;;  %s143_s12 = sshll.u32 %s273_s11, 4  ;;  %s144_s12 = int_to_ptr.vmem [resolvable:$true] %s143_s12 }
  0x2e   :  { %s215_s13 = scalar_lea.vmem %s132_s10, 256 }
  0x2f   :  { %v48_v2 = vld [vmem:[#allocation2] sm:$0xf]  ;;  %v115_v44 = vmul.f32 0.05, %v109_v40  ;;  %v117_v46 = vmul.f32 10.0, %v109_v40  ;;  %p216_p2 = scmp.ne.s32.totalorder %s132_s10, %s215_s13  ;;  %p221_p4 = scmp.lt.s32.totalorder %s215_s13, %s215_s13 }
  0x30   :  { %v52_v4 = vmul.f32 0.5, %v48_v2 }
  0x31   :  { %p222_p5 = por %p221_p4, %p220_p3 }
  0x32   :  { %v53_v6 = vadd.f32 %v52_v4, %v49_v3 }
  0x33   :  { %p223_p6 = pnand %p222_p5, %p216_p2 }
  0x34   :  { %vm54_vm0 = vcmp.gt.f32.partialorder %v53_v6, 1.0  ;;  %v160_v7 = vadd.f32 -1.0, %v53_v6 }
  0x35   :  { %v61_v10 = vsel %vm54_vm0, 1.0, %v271_v0 }
  0x36   :  { %62 = vst [vmem:[#allocation8] sm:$0xf] %v61_v10  ;;  %v64_v12 = vsel %vm54_vm0, %v160_v7, %v53_v6  ;;  %v56_v13 = vand.u32 2147483647, %v160_v7 }
  0x37   :  { %v70_v15 = vmul.f32 0.5, %v64_v12 }
  0x38   :  { %vm58_vm1 = vcmp.lt.f32.partialorder %v56_v13, %v57_v8 }
  0x39   :  { %v60_v17 = vsel %vm58_vm1, %v59_v11, 0.0  ;;  %v71_v18 = vadd.f32 %v70_v15, %v66_v14 }
  0x3a   :  { %63 = vst [vmem:[#allocation9] sm:$0xf] %v60_v17 }
  0x3b   :  { %vm72_vm2 = vcmp.gt.f32.partialorder %v71_v18, 1.0  ;;  %v161_v19 = vadd.f32 -1.0, %v71_v18 }
  0x3c   :  { %v79_v22 = vsel %vm72_vm2, 1.0, %v271_v0 }
  0x3d   :  { %81 = vst [vmem:[#allocation8 + $0x4] sm:$0xf] %v79_v22  ;;  %v84_v24 = vsel %vm72_vm2, %v161_v19, %v71_v18  ;;  %v74_v25 = vand.u32 2147483647, %v161_v19 }
  0x3e   :  { %v90_v27 = vmul.f32 0.5, %v84_v24 }
  0x3f   :  { %vm76_vm3 = vcmp.lt.f32.partialorder %v74_v25, %v75_v20 }
  0x40   :  { %v78_v29 = vsel %vm76_vm3, %v77_v23, 0.0  ;;  %v91_v30 = vadd.f32 %v90_v27, %v86_v26 }
  0x41   :  { %83 = vst [vmem:[#allocation9 + $0x4] sm:$0xf] %v78_v29 }
  0x42   :  { %vm92_vm4 = vcmp.gt.f32.partialorder %v91_v30, 1.0  ;;  %v162_v31 = vadd.f32 -1.0, %v91_v30 }
  0x43   :  { %v99_v34 = vsel %vm92_vm4, 1.0, %v271_v0 }
  0x44   :  { %101 = vst [vmem:[#allocation8 + $0x8] sm:$0xf] %v99_v34  ;;  %v104_v36 = vsel %vm92_vm4, %v162_v31, %v91_v30  ;;  %v94_v37 = vand.u32 2147483647, %v162_v31 }
  0x45   :  { %v110_v39 = vmul.f32 0.5, %v104_v36 }
  0x46   :  { %vm96_vm5 = vcmp.lt.f32.partialorder %v94_v37, %v95_v32 }
  0x47   :  { %v98_v41 = vsel %vm96_vm5, %v97_v35, 0.0  ;;  %v111_v42 = vadd.f32 %v110_v39, %v106_v38 }
  0x48   :  { %103 = vst [vmem:[#allocation9 + $0x8] sm:$0xf] %v98_v41 }
  0x49   :  { %vm112_vm6 = vcmp.gt.f32.partialorder %v111_v42, 1.0  ;;  %v163_v43 = vadd.f32 -1.0, %v111_v42 }
  0x4a   :  { %v119_v45 = vsel %vm112_vm6, 1.0, %v271_v0 }
  0x4b   :  { %121 = vst [vmem:[#allocation8 + $0xc] sm:$0xf] %v119_v45  ;;  %v124_v47 = vsel %vm112_vm6, %v163_v43, %v111_v42  ;;  %v114_v48 = vand.u32 2147483647, %v163_v43 }
  0x4c   :  { %125 = vst [vmem:[#allocation2] sm:$0xf] %v124_v47 }
  0x4d   :  { %226 = shalt.err (!%p223_p6)
}
  0x4e   :  { %s227_s16 = scalar_lea.hbm %s356_s2, 256 }
  0x4f   :  { %p228_p7 = scmp.ne.s32.totalorder %s356_s2, %s227_s16  ;;  %p231_p8 = scmp.lt.u32.totalorder %s227_s16, %s356_s2 }
  0x51   :  { %p233_p9 = pnand %p231_p8, %p228_p7 }
  0x53   :  { %236 = shalt.err (!%p233_p9)
}
  0x54   :  { %137 = dma.vmem_to_hbm [thread:$0]  %s132_s10, 256, %s356_s2, [#allocation5], %s268_s22, %s268_s22, %s269_s23   ;;  %vm116_vm7 = vcmp.lt.f32.partialorder %v114_v48, %v115_v44 }
  0x55   :  { %v118_v49 = vsel %vm116_vm7, %v117_v46, 0.0  ;;  %s237_s25 = scalar_lea.vmem %s144_s12, 256  ;;  %p242_p11 = scmp.lt.s32.totalorder %s144_s12, %s144_s12 }
  0x56   :  { %123 = vst [vmem:[#allocation9 + $0xc] sm:$0xf] %v118_v49  ;;  %p238_p10 = scmp.ne.s32.totalorder %s144_s12, %s237_s25  ;;  %p243_p12 = scmp.lt.s32.totalorder %s237_s25, %s237_s25 }
  0x58   :  { %p244_p13 = por %p243_p12, %p242_p11 }
  0x5a   :  { %p245_p0 = pnand %p244_p13, %p238_p10 }
  0x5c   :  { %248 = shalt.err (!%p245_p0)
}
  0x5d   :  { %s249_s28 = scalar_lea.hbm %s357_s3, 256 }
  0x5e   :  { %p250_p1 = scmp.ne.s32.totalorder %s357_s3, %s249_s28  ;;  %p253_p2 = scmp.lt.u32.totalorder %s249_s28, %s357_s3 }
  0x60   :  { %p255_p3 = pnand %p253_p2, %p250_p1 }
  0x62   :  { %258 = shalt.err (!%p255_p3)
}
  0x63   :  { %149 = dma.vmem_to_hbm [thread:$0]  %s144_s12, 256, %s357_s3, [#allocation10], %s268_s22, %s268_s22, %s269_s23  }
  0x64   :  { %263 = dma.done.wait [#allocation5], 256  }
  0x65   :  { %264 = vsyncadd [#allocation5], 4294967040 }
  0x66   :  { %265 = dma.done.wait [#allocation10], 256  }
  0x67   :  { %266 = vsyncadd [#allocation10], 4294967040 }
  0x68   :  { %156 = vsyncpa [#allocation4], 1 }
  0x69   :  { %157 = vsyncpa [#allocation7], 1 }
  0x6a   :  { %158 = vsyncpa [#allocation5], 1 }
  0x6b   :  { %159 = vsyncpa [#allocation10], 1 }

</bundles_post_ra>
